<compile_context>
chip_gen: v7x
topology: tpu7x:2x2x1
jax: 0.10.0
libtpu: 0.0.40
codegen_flags: <defaults>
</compile_context>

<pallas_src>
import functools

import jax
import jax.numpy as jnp
from jax.experimental import pallas as pl
from jax.experimental.pallas import tpu as pltpu


def _round_up(x, m):
    return (x + m - 1) // m * m


def _vmem_capacity_bytes():
    try:
        return int(pltpu.get_tpu_info().vmem_capacity_bytes)
    except Exception:
        return 64 << 20  # v7x per-TensorCore VMEM (most conservative)


# ---------------------------------------------------------------------------
# Kernel: full MLP + softmax for one batch tile.
# ---------------------------------------------------------------------------
def _policy_kernel(x_ref, w1_ref, b1_ref, w2_ref, b2_ref, w3_ref, b3_ref,
                   out_ref):
    # Matmul operands in the weight dtype (bf16 -> MXU native); accumulate f32.
    x = x_ref[...].astype(w1_ref.dtype)

    # Layer 1: Linear(state_dim -> hidden_pad) + ReLU
    h = jnp.dot(x, w1_ref[...], preferred_element_type=jnp.float32) + b1_ref[...]
    h = jnp.maximum(h, 0.0)

    # Layer 2: Linear(hidden_pad -> hidden_pad) + ReLU   (num_layers = 2)
    h = jnp.dot(h.astype(w2_ref.dtype), w2_ref[...],
                preferred_element_type=jnp.float32) + b2_ref[...]
    h = jnp.maximum(h, 0.0)

    # Output head: Linear(hidden_pad -> action_pad).  Padded action columns
    # carry a -1e30 bias so exp(logit - m) underflows to exactly 0 and they
    # drop out of the softmax denominator.
    logits = jnp.dot(h.astype(w3_ref.dtype), w3_ref[...],
                     preferred_element_type=jnp.float32) + b3_ref[...]

    # Numerically stable softmax over the lane-dense padded action axis.
    m = jnp.max(logits, axis=-1, keepdims=True)
    e = jnp.exp(logits - m)
    s = jnp.sum(e, axis=-1, keepdims=True)
    r = pl.reciprocal(s, approx=True)        # EUP slot (otherwise idle)
    r = r * (2.0 - s * r)                    # one Newton step -> ~f32 accuracy
    probs = e * r

    # Write back only the real action columns (no padded-lane writeback).
    a_out = out_ref.shape[-1]
    out_ref[...] = probs[:, :a_out].astype(out_ref.dtype)


# ---------------------------------------------------------------------------
# One-time parameter preparation (hoisted out of the per-call hot path).
# ---------------------------------------------------------------------------
def prepare_params(w1, b1, w2, b2, w3, b3, *, use_bf16=True):
    """Pad & cast the MLP weights ONCE.

    * hidden dim zero-padded to a multiple of 128 (exact: padded units are
      ReLU(0)=0 and feed zero weights downstream)
    * action dim zero-padded to a multiple of 128; padded biases are -1e30 so
      those logits contribute exactly 0 to the softmax
    * weights cast to bf16 for the MXU (accumulation stays f32 in-kernel)

    Returns (params_tuple, action_num).
    """
    w1 = jnp.asarray(w1, jnp.float32)
    w2 = jnp.asarray(w2, jnp.float32)
    w3 = jnp.asarray(w3, jnp.float32)
    b1 = jnp.asarray(b1, jnp.float32).reshape(1, -1)
    b2 = jnp.asarray(b2, jnp.float32).reshape(1, -1)
    b3 = jnp.asarray(b3, jnp.float32).reshape(1, -1)

    state_dim, hidden_dim = w1.shape
    action_num = int(w3.shape[1])
    h_pad = _round_up(max(hidden_dim, 128), 128)
    a_pad = _round_up(max(action_num, 128), 128)
    wdt = jnp.bfloat16 if use_bf16 else jnp.float32

    w1p = jnp.pad(w1, ((0, 0), (0, h_pad - hidden_dim))).astype(wdt)
    w2p = jnp.pad(w2, ((0, h_pad - hidden_dim),
                       (0, h_pad - hidden_dim))).astype(wdt)
    w3p = jnp.pad(w3, ((0, h_pad - hidden_dim),
                       (0, a_pad - action_num))).astype(wdt)
    b1p = jnp.pad(b1, ((0, 0), (0, h_pad - hidden_dim)))
    b2p = jnp.pad(b2, ((0, 0), (0, h_pad - hidden_dim)))
    b3p = jnp.pad(b3, ((0, 0), (0, a_pad - action_num)),
                  constant_values=-1e30)

    return (w1p, b1p, w2p, b2p, w3p, b3p), action_num


# ---------------------------------------------------------------------------
# Forward pass on prepared params.
# ---------------------------------------------------------------------------
@functools.partial(jax.jit, static_argnames=("action_num", "batch_tile"))
def policy_forward_prepared(state, params, *, action_num, batch_tile=2048):
    """softmax(MLP(state)) -- matches PolicyModel.forward (prepared params)."""
    w1, b1, w2, b2, w3, b3 = params
    state = jnp.asarray(state, jnp.float32)
    B, state_dim = state.shape
    h_pad = w1.shape[1]
    a_pad = w3.shape[1]

    # ---- batch tiling -----------------------------------------------------
    # * big default tile (amortizes the ~0.35 us per-grid-step overhead)
    # * for moderate B clamp to ceil(B/2) so the "parallel" grid has >= 2
    #   steps and both v7x TensorCores get work (neutral on v5e/v6e)
    # * ragged last block handled by Pallas boundary clipping (no host pad)
    if B <= 8:
        tile = B                         # single step; block == full batch dim
    else:
        tile = min(batch_tile, _round_up((B + 1) // 2, 8))
    grid = (pl.cdiv(B, tile),)

    # Weights/biases use the same (full) block every grid step: single-buffer.
    def _const(shape):
        return pl.BlockSpec(shape, lambda i: (0, 0),
                            pipeline_mode=pl.Buffered(1))

    # VMEM budget: double-buffered x/out tiles + single-buffered weights,
    # plus headroom for (tile, h_pad/a_pad) f32 intermediates. Generation-
    # aware clamp (128 MiB on v5e/v6e, 64 MiB per core on v7x).
    wsize = w1.dtype.itemsize
    est = (2 * tile * state_dim * 4
           + 2 * tile * action_num * 4
           + (state_dim * h_pad + h_pad * h_pad + h_pad * a_pad) * wsize
           + (2 * h_pad + a_pad) * 4
           + 6 * tile * max(h_pad, a_pad) * 4)
    vmem_limit = int(min(max(2 * est, 16 << 20), _vmem_capacity_bytes()))

    return pl.pallas_call(
        _policy_kernel,
        out_shape=jax.ShapeDtypeStruct((B, action_num), jnp.float32),
        grid_spec=pltpu.PrefetchScalarGridSpec(
            num_scalar_prefetch=0,
            grid=grid,
            in_specs=[
                pl.BlockSpec((tile, state_dim), lambda i: (i, 0)),  # x
                _const((state_dim, h_pad)),   # w1
                _const((1, h_pad)),           # b1
                _const((h_pad, h_pad)),       # w2
                _const((1, h_pad)),           # b2
                _const((h_pad, a_pad)),       # w3 (lane-padded)
                _const((1, a_pad)),           # b3 (lane-padded, -1e30 fill)
            ],
            out_specs=pl.BlockSpec((tile, action_num), lambda i: (i, 0)),
        ),
        compiler_params=pltpu.CompilerParams(
            dimension_semantics=("parallel",),
            vmem_limit_bytes=vmem_limit),
    )(state, w1, b1, w2, b2, w3, b3)


def policy_forward(state, w1, b1, w2, b2, w3, b3, *, use_bf16=True,
                   batch_tile=2048):
    """One-shot convenience wrapper (prep + forward).  For repeated calls,
    run prepare_params() once and call policy_forward_prepared()."""
    params, action_num = prepare_params(w1, b1, w2, b2, w3, b3,
                                        use_bf16=use_bf16)
    return policy_forward_prepared(state, params, action_num=action_num,
                                   batch_tile=batch_tile)


# ---------------------------------------------------------------------------
# Deterministic init + pure-JAX reference (for testing).
# ---------------------------------------------------------------------------
def init_params(key, state_dim, hidden_dim, action_num):
    """Deterministic init mimicking nn.Linear (uniform +/- 1/sqrt(fan_in))."""
    def linear(k, fan_in, fan_out):
        kw, kb = jax.random.split(k)
        bound = 1.0 / jnp.sqrt(fan_in)
        w = jax.random.uniform(kw, (fan_in, fan_out), jnp.float32, -bound, bound)
        b = jax.random.uniform(kb, (1, fan_out), jnp.float32, -bound, bound)
        return w, b

    k1, k2, k3 = jax.random.split(key, 3)
    w1, b1 = linear(k1, state_dim, hidden_dim)
    w2, b2 = linear(k2, hidden_dim, hidden_dim)
    w3, b3 = linear(k3, hidden_dim, action_num)
    return w1, b1, w2, b2, w3, b3


def reference_forward(state, w1, b1, w2, b2, w3, b3, dtype=jnp.float32):
    """Pure-JAX reference; `dtype` controls the matmul operand precision."""
    cast = lambda a: a.astype(dtype)
    h = jnp.maximum(jnp.dot(cast(state), cast(w1),
                            preferred_element_type=jnp.float32) + b1, 0.0)
    h = jnp.maximum(jnp.dot(cast(h), cast(w2),
                            preferred_element_type=jnp.float32) + b2, 0.0)
    logits = jnp.dot(cast(h), cast(w3),
                     preferred_element_type=jnp.float32) + b3
    return jax.nn.softmax(logits, axis=-1)


if __name__ == "__main__":
    # Small shapes consistent with the module: PolicyModel(state_dim=8,
    # actions=np.arange(4), hidden_dim=32, num_layers=2), batch of 16 states.
    B, state_dim, hidden_dim, action_num = 16, 8, 32, 4

    key = jax.random.PRNGKey(0)
    k_params, k_state = jax.random.split(key)
    raw_params = init_params(k_params, state_dim, hidden_dim, action_num)
    state = jax.random.normal(k_state, (B, state_dim), jnp.float32)

    # One-time weight prep (padding + bf16 cast), then the fast forward.
    params, a_num = prepare_params(*raw_params, use_bf16=True)
    probs = jax.block_until_ready(
        policy_forward_prepared(state, params, action_num=a_num))

    ref_bf16 = reference_forward(state, *raw_params, dtype=jnp.bfloat16)
    ref_f32 = reference_forward(state, *raw_params, dtype=jnp.float32)

    assert probs.shape == (B, action_num)
    # rows of a softmax must sum to 1
    assert jnp.allclose(jnp.sum(probs, axis=-1), 1.0, atol=1e-4)
    # matches a precision-matched (bf16 matmul, f32 accum) reference tightly
    assert jnp.allclose(probs, ref_bf16, atol=2e-3, rtol=2e-3)
    # and the full-f32 reference within bf16 rounding error
    assert jnp.allclose(probs, ref_f32, atol=2e-2, rtol=2e-2)

    # Ragged batch exercises the boundary-clipped last grid step (no host pad).
    state2 = jax.random.normal(jax.random.PRNGKey(1), (13, state_dim),
                               jnp.float32)
    probs2 = jax.block_until_ready(
        policy_forward_prepared(state2, params, action_num=a_num))
    assert probs2.shape == (13, action_num)
    assert jnp.allclose(jnp.sum(probs2, axis=-1), 1.0, atol=1e-4)
    assert jnp.allclose(probs2,
                        reference_forward(state2, *raw_params,
                                          dtype=jnp.bfloat16),
                        atol=2e-3, rtol=2e-3)

    # Tiny batch exercises the single-step (block == batch) path.
    state3 = jax.random.normal(jax.random.PRNGKey(2), (4, state_dim),
                               jnp.float32)
    probs3 = jax.block_until_ready(
        policy_forward_prepared(state3, params, action_num=a_num))
    assert probs3.shape == (4, action_num)
    assert jnp.allclose(jnp.sum(probs3, axis=-1), 1.0, atol=1e-4)

    print("KERNEL_OK")
</pallas_src>

<mosaic_0001>
module attributes {stable_mosaic.version = 11 : i64} {
  func.func @_policy_kernel(%arg0: i32, %arg1: memref<8x8xf32, #tpu.memory_space<vmem>>, %arg2: memref<8x128xbf16, #tpu.memory_space<vmem>>, %arg3: memref<1x128xf32, #tpu.memory_space<vmem>>, %arg4: memref<128x128xbf16, #tpu.memory_space<vmem>>, %arg5: memref<1x128xf32, #tpu.memory_space<vmem>>, %arg6: memref<128x128xbf16, #tpu.memory_space<vmem>>, %arg7: memref<1x128xf32, #tpu.memory_space<vmem>>, %arg8: memref<8x4xf32, #tpu.memory_space<vmem>>) attributes {dimension_semantics = [#tpu.dimension_semantics<parallel>], iteration_bounds = array<i64: 2>, scalar_prefetch = 0 : i64, scratch_operands = 0 : i64, tpu.core_type = #tpu.core_type<tc>, window_params = [{transform_indices = @transform_0, window_bounds = array<i64: 8, 8>}, {pipeline_mode = #tpu.pipeline_mode<synchronous>, transform_indices = @transform_1, window_bounds = array<i64: 8, 128>}, {pipeline_mode = #tpu.pipeline_mode<synchronous>, transform_indices = @transform_2, window_bounds = array<i64: 1, 128>}, {pipeline_mode = #tpu.pipeline_mode<synchronous>, transform_indices = @transform_3, window_bounds = array<i64: 128, 128>}, {pipeline_mode = #tpu.pipeline_mode<synchronous>, transform_indices = @transform_4, window_bounds = array<i64: 1, 128>}, {pipeline_mode = #tpu.pipeline_mode<synchronous>, transform_indices = @transform_5, window_bounds = array<i64: 128, 128>}, {pipeline_mode = #tpu.pipeline_mode<synchronous>, transform_indices = @transform_6, window_bounds = array<i64: 1, 128>}, {transform_indices = @transform_7, window_bounds = array<i64: 8, 4>}]} {
    %c0 = arith.constant 0 : index
    %c0_0 = arith.constant 0 : index
    %0 = vector.load %arg1[%c0, %c0_0] : memref<8x8xf32, #tpu.memory_space<vmem>>, vector<8x8xf32>
    %1 = arith.truncf %0 : vector<8x8xf32> to vector<8x8xbf16>
    %c0_1 = arith.constant 0 : index
    %c0_2 = arith.constant 0 : index
    %2 = vector.load %arg2[%c0_1, %c0_2] : memref<8x128xbf16, #tpu.memory_space<vmem>>, vector<8x128xbf16>
    %cst = arith.constant dense<0.000000e+00> : vector<8x128xf32>
    %3 = tpu.matmul %1, %2, %cst {dimension_numbers = #tpu.dot_dimension_numbers<[1], [0], [0], [1], [0, 0, 1, 1], [], []>} : vector<8x8xbf16>, vector<8x128xbf16>, vector<8x128xf32> -> vector<8x128xf32>
    %c0_3 = arith.constant 0 : index
    %c0_4 = arith.constant 0 : index
    %4 = vector.load %arg3[%c0_3, %c0_4] : memref<1x128xf32, #tpu.memory_space<vmem>>, vector<1x128xf32>
    %5 = vector.broadcast %4 : vector<1x128xf32> to vector<8x128xf32>
    %6 = arith.addf %3, %5 : vector<8x128xf32>
    %cst_5 = arith.constant 0.000000e+00 : f32
    %7 = vector.broadcast %cst_5 : f32 to vector<8x128xf32>
    %8 = arith.maximumf %6, %7 : vector<8x128xf32>
    %9 = arith.truncf %8 : vector<8x128xf32> to vector<8x128xbf16>
    %c0_6 = arith.constant 0 : index
    %c0_7 = arith.constant 0 : index
    %10 = vector.load %arg4[%c0_6, %c0_7] : memref<128x128xbf16, #tpu.memory_space<vmem>>, vector<128x128xbf16>
    %cst_8 = arith.constant dense<0.000000e+00> : vector<8x128xf32>
    %11 = tpu.matmul %9, %10, %cst_8 {dimension_numbers = #tpu.dot_dimension_numbers<[1], [0], [0], [1], [0, 0, 1, 1], [], []>} : vector<8x128xbf16>, vector<128x128xbf16>, vector<8x128xf32> -> vector<8x128xf32>
    %c0_9 = arith.constant 0 : index
    %c0_10 = arith.constant 0 : index
    %12 = vector.load %arg5[%c0_9, %c0_10] : memref<1x128xf32, #tpu.memory_space<vmem>>, vector<1x128xf32>
    %13 = vector.broadcast %12 : vector<1x128xf32> to vector<8x128xf32>
    %14 = arith.addf %11, %13 : vector<8x128xf32>
    %cst_11 = arith.constant 0.000000e+00 : f32
    %15 = vector.broadcast %cst_11 : f32 to vector<8x128xf32>
    %16 = arith.maximumf %14, %15 : vector<8x128xf32>
    %17 = arith.truncf %16 : vector<8x128xf32> to vector<8x128xbf16>
    %c0_12 = arith.constant 0 : index
    %c0_13 = arith.constant 0 : index
    %18 = vector.load %arg6[%c0_12, %c0_13] : memref<128x128xbf16, #tpu.memory_space<vmem>>, vector<128x128xbf16>
    %cst_14 = arith.constant dense<0.000000e+00> : vector<8x128xf32>
    %19 = tpu.matmul %17, %18, %cst_14 {dimension_numbers = #tpu.dot_dimension_numbers<[1], [0], [0], [1], [0, 0, 1, 1], [], []>} : vector<8x128xbf16>, vector<128x128xbf16>, vector<8x128xf32> -> vector<8x128xf32>
    %c0_15 = arith.constant 0 : index
    %c0_16 = arith.constant 0 : index
    %20 = vector.load %arg7[%c0_15, %c0_16] : memref<1x128xf32, #tpu.memory_space<vmem>>, vector<1x128xf32>
    %21 = vector.broadcast %20 : vector<1x128xf32> to vector<8x128xf32>
    %22 = arith.addf %19, %21 : vector<8x128xf32>
    %cst_17 = arith.constant dense<0xFF800000> : vector<8xf32>
    %23 = vector.multi_reduction <maximumf>, %22, %cst_17 [1] : vector<8x128xf32> to vector<8xf32>
    %24 = vector.shape_cast %23 : vector<8xf32> to vector<8x1xf32>
    %25 = vector.broadcast %24 : vector<8x1xf32> to vector<8x128xf32>
    %26 = arith.subf %22, %25 : vector<8x128xf32>
    %27 = math.exp %26 : vector<8x128xf32>
    %cst_18 = arith.constant dense<0.000000e+00> : vector<8xf32>
    %28 = vector.multi_reduction <add>, %27, %cst_18 [1] : vector<8x128xf32> to vector<8xf32>
    %29 = vector.shape_cast %28 : vector<8xf32> to vector<8x1xf32>
    %30 = tpu.reciprocal %29 {approx = true} : vector<8x1xf32> -> vector<8x1xf32>
    %31 = arith.mulf %29, %30 : vector<8x1xf32>
    %cst_19 = arith.constant 2.000000e+00 : f32
    %32 = vector.broadcast %cst_19 : f32 to vector<8x1xf32>
    %33 = arith.subf %32, %31 : vector<8x1xf32>
    %34 = arith.mulf %30, %33 : vector<8x1xf32>
    %35 = vector.broadcast %34 : vector<8x1xf32> to vector<8x128xf32>
    %36 = arith.mulf %27, %35 : vector<8x128xf32>
    %37 = vector.extract_strided_slice %36 {offsets = [0, 0], sizes = [8, 4], strides = [1, 1]} : vector<8x128xf32> to vector<8x4xf32>
    %c0_20 = arith.constant 0 : index
    %c0_21 = arith.constant 0 : index
    %38 = vector.load %arg8[%c0_20, %c0_21] : memref<8x4xf32, #tpu.memory_space<vmem>>, vector<8x4xf32>
    tpu.vector_store %arg8[%c0_20, %c0_21], %37 {strides = array<i32>} : memref<8x4xf32, #tpu.memory_space<vmem>>, vector<8x4xf32>,
    return
  }
  func.func @transform_0(%arg0: i32) -> (i32, i32) {
    %c0_i32 = arith.constant 0 : i32
    %c0_i32_0 = arith.constant 0 : i32
    return %arg0, %c0_i32 : i32, i32
  }
  func.func @transform_1(%arg0: i32) -> (i32, i32) {
    %c0_i32 = arith.constant 0 : i32
    %c0_i32_0 = arith.constant 0 : i32
    %c0_i32_1 = arith.constant 0 : i32
    return %c0_i32, %c0_i32_0 : i32, i32
  }
  func.func @transform_2(%arg0: i32) -> (i32, i32) {
    %c0_i32 = arith.constant 0 : i32
    %c0_i32_0 = arith.constant 0 : i32
    %c0_i32_1 = arith.constant 0 : i32
    return %c0_i32, %c0_i32_0 : i32, i32
  }
  func.func @transform_3(%arg0: i32) -> (i32, i32) {
    %c0_i32 = arith.constant 0 : i32
    %c0_i32_0 = arith.constant 0 : i32
    %c0_i32_1 = arith.constant 0 : i32
    return %c0_i32, %c0_i32_0 : i32, i32
  }
  func.func @transform_4(%arg0: i32) -> (i32, i32) {
    %c0_i32 = arith.constant 0 : i32
    %c0_i32_0 = arith.constant 0 : i32
    %c0_i32_1 = arith.constant 0 : i32
    return %c0_i32, %c0_i32_0 : i32, i32
  }
  func.func @transform_5(%arg0: i32) -> (i32, i32) {
    %c0_i32 = arith.constant 0 : i32
    %c0_i32_0 = arith.constant 0 : i32
    %c0_i32_1 = arith.constant 0 : i32
    return %c0_i32, %c0_i32_0 : i32, i32
  }
  func.func @transform_6(%arg0: i32) -> (i32, i32) {
    %c0_i32 = arith.constant 0 : i32
    %c0_i32_0 = arith.constant 0 : i32
    %c0_i32_1 = arith.constant 0 : i32
    return %c0_i32, %c0_i32_0 : i32, i32
  }
  func.func @transform_7(%arg0: i32) -> (i32, i32) {
    %c0_i32 = arith.constant 0 : i32
    %c0_i32_0 = arith.constant 0 : i32
    return %arg0, %c0_i32 : i32, i32
  }
}

</mosaic_0001>

<bundles_post_ra>
// kernel: policy_forward_prepared.1
= control target key start
LH: loop header
LB: loop body
LE: loop exit
PB: predicated region body
PF: predicated region fallthrough
CT: control target
= control target key end

     0   :  { %12 = vsyncpa [#allocation3], 0  ;;  %s1083_s0 = inlined_call_operand.vmem [shape: f32[16,8], index: 0, kind: input, shape index: {}]   ;;  %s1084_s1 = inlined_call_operand.vmem [shape: bf16[8,128], index: 1, kind: input, shape index: {}]   ;;  %s1085_s2 = inlined_call_operand.vmem [shape: f32[1,128], index: 2, kind: input, shape index: {}]   ;;  %s1086_s3 = inlined_call_operand.hbm [shape: bf16[128,128], index: 3, kind: input, shape index: {}]   ;;  %s1087_s4 = inlined_call_operand.vmem [shape: f32[1,128], index: 4, kind: input, shape index: {}]   ;;  %s1088_s5 = inlined_call_operand.hbm [shape: bf16[128,128], index: 5, kind: input, shape index: {}]   ;;  %s1089_s6 = inlined_call_operand.vmem [shape: f32[1,128], index: 6, kind: input, shape index: {}]   ;;  %s1090_s7 = inlined_call_operand.vmem [shape: f32[16,4], index: 7, kind: output, shape index: {}]  }
   0x1   :  { %13 = vsyncpa [#allocation5], 0  ;;  %s948_s24 = smov 0  }
   0x2 LB: > { %s954_s25 = sadd.s32 4294967295, %s900_s24   ;;  %p680_p0 = scmp.ge.s32.totalorder %s900_s24, 1  ;;  %s900_s24 = sphi %s948_s24, %s19_s24  }
   0x3   : > { %p202_p1 = scmp.lt.s32.totalorder %s900_s24, 3  ;;  %s902_s26 = smov [#allocation2]  }
   0x4   : > { %s220_s27 = sshll.u32 %s902_s26, 4  ;;  %p1091_p3 = scmp.eq.s32.totalorder %s954_s25, 0  ;;  %s221_s27 = int_to_ptr.vmem [resolvable:$true] %s220_s27 }
   0x5   : > { %p958_p2 = pnand %p680_p0, %p202_p1  ;;  %s903_s29 = smov [#allocation4]  }
   0x6   : > { %s236_s30 = sshll.u32 %s903_s29, 4  ;;  %s830_s11 = scalar_lea.hbm %s1086_s3, 1024  ;;  %s971_s30 = int_to_ptr.vmem [resolvable:$true] %s236_s30 }
   0x7   : > { %s1093_s28 = scalar_select %p958_p2, 1, 0 }
   0x8   : > { %p785_p4 = pneg %p958_p2  ;;  %p831_p6 = scmp.ne.s32.totalorder %s1086_s3, %s830_s11 }
   0x9   : > { %p837_p10 = scmp.lt.u32.totalorder %s830_s11, %s1086_s3 }
   0xa   : > { %p967_p5 = pnand %p1091_p3, %p785_p4 }
   0xc   : > { %p832_p7 = pneg %p967_p5 }
   0xe   : > { %p833_p8 = pnand %p832_p7, %p831_p6 }
  0x10   : > { %p834_p9 = pneg %p833_p8 }
  0x12   : > { %p839_p11 = pnand %p837_p10, %p834_p9 }
  0x14   : > { %842 = shalt.err (!%p839_p11)
}
  0x15   : > { %s843_s16 = scalar_lea.vmem %s221_s27, 1024  ;;  %p851_p1 = scmp.lt.s32.totalorder %s221_s27, %s221_s27 }
  0x16   : > { %p844_p12 = scmp.ne.s32.totalorder %s221_s27, %s843_s16  ;;  %p852_p4 = scmp.lt.s32.totalorder %s843_s16, %s843_s16 }
  0x18   : > { %p846_p13 = pnand %p844_p12, %p832_p7  ;;  %p853_p3 = por %p852_p4, %p851_p1 }
  0x1a   : > { %p847_p0 = pneg %p846_p13 }
  0x1c   : > { %p854_p2 = pnand %p853_p3, %p847_p0 }
  0x1e   : > { %857 = shalt.err (!%p854_p2)
}
  0x1f   : > { %s904_s17 = smov 64   ;;  %s905_s18 = smov 4  }
  0x20   : > { %788 = dma.hbm_to_vmem [thread:$0]  (!%p967_p5), %s1086_s3, 1024, %s221_s27, [#allocation3], %s904_s17, %s904_s17, %s905_s18  }
  0x21   : > { %s858_s23 = scalar_lea.hbm %s1088_s5, 1024 }
  0x22   : > { %p859_p6 = scmp.ne.s32.totalorder %s1088_s5, %s858_s23  ;;  %p865_p8 = scmp.lt.u32.totalorder %s858_s23, %s1088_s5 }
  0x24   : > { %p861_p2 = pnand %p859_p6, %p832_p7 }
  0x26   : > { %p862_p3 = pneg %p861_p2 }
  0x28   : > { %p867_p9 = pnand %p865_p8, %p862_p3 }
  0x2a   : > { %870 = shalt.err (!%p867_p9)
}
  0x2b   : > { %s871_s27 = scalar_lea.vmem %s971_s30, 1024  ;;  %p879_p13 = scmp.lt.s32.totalorder %s971_s30, %s971_s30 }
  0x2c   : > { %p872_p10 = scmp.ne.s32.totalorder %s971_s30, %s871_s27  ;;  %p880_p0 = scmp.lt.s32.totalorder %s871_s27, %s871_s27 }
  0x2e   : > { %p874_p11 = pnand %p872_p10, %p832_p7  ;;  %p881_p1 = por %p880_p0, %p879_p13 }
  0x30   : > { %p875_p12 = pneg %p874_p11 }
  0x32   : > { %p882_p4 = pnand %p881_p1, %p875_p12 }
  0x34   : > { %885 = shalt.err (!%p882_p4)
}
  0x35   : > { %791 = dma.hbm_to_vmem [thread:$0]  (!%p967_p5), %s1088_s5, 1024, %s971_s30, [#allocation5], %s904_s17, %s904_s17, %s905_s18  }
  0x36   : > { %p1095_p6 = scmp.ne.s32.totalorder %s1093_s28, 0 }
  0x37   : > { %p1096_p2 = scmp.eq.s32.totalorder (!%p1095_p6), %s954_s25, 0 }
  0x38   : > { %262 = sbr.rel (%p1095_p6) target bundleno = 1044 (0x414), region = 48 }
  0x3f   : > { %891 = dma.done.wait (%p1096_p2), [#allocation3], 1024   ;;  %p1097_p7 = pmov %p1096_p2 }
  0x40   : > { %p1098_p3 = pmov %p1096_p2 }
  0x41   : > { %893 = vsyncadd (%p1097_p7), [#allocation3], 4294966272 }
  0x42   : > { %895 = dma.done.wait (%p1098_p3), [#allocation5], 1024   ;;  %p1099_p8 = pmov %p1096_p2 }
  0x43   : > { %p296_p9 = scmp.lt.s32.totalorder %s954_s25, 1  ;;  %v906_v0 = vmov 0.0   ;;  %vm907_vm0 = vmmov 0   ;;  %vm319_vm1 = vcmask 1043456   ;;  %v307_v1 = vld [vmem:[%s1084_s1] sm:$0xf] }
  0x44   : > { %897 = vsyncadd (%p1099_p8), [#allocation5], 4294966272  ;;  %731 = vmatprep.subr.bf16.mxu0 %v906_v0  ;;  %733 = vmatprep.mubr.msk.bf16.mxu0 %vm907_vm0, %v906_v0  ;;  %v321_v3 = vsel %vm319_vm1, %v307_v1, 0  ;;  %v810_v5 = vld [vmem:[#allocation2] sm:$0xff]   ;;  %vm315_vm2 = vcmask 64512   ;;  %v811_v6 = vld [vmem:[#allocation2 + $0x8] sm:$0xff]  }
  0x45   : > { %s1101_s25 = smov (!%p296_p9, %s954_s25), 1  ;;  %737 = vmatprep.subr.bf16.mxu1 %v906_v0  ;;  %753 = vmatprep.mubr.msk.bf16.mxu1 %vm907_vm0, %v906_v0  ;;  %v812_v7 = vld [vmem:[#allocation2 + $0x10] sm:$0xff]   ;;  %v813_v8 = vld [vmem:[#allocation2 + $0x18] sm:$0xff]   ;;  %v814_v9 = vld [vmem:[#allocation2 + $0x20] sm:$0xff]   ;;  %vm601_vm3 = vcmask 31744  }
  0x46   : > { %s687_s28 = sshll.u32 %s1101_s25, 3  ;;  %732 = vmatpush3.bf16.msra.mxu0 %v321_v3  ;;  %738 = vmatpush3.bf16.msra.mxu1 %v810_v5  ;;  %v815_v10 = vld [vmem:[#allocation2 + $0x28] sm:$0xff]   ;;  %v816_v11 = vld [vmem:[#allocation2 + $0x30] sm:$0xff]   ;;  %v817_v12 = vld [vmem:[#allocation2 + $0x38] sm:$0xff]  }
  0x47   : > { %s299_s13 = scalar_lea.vmem %s1083_s0, %s687_s28  ;;  %757 = vmatprep.subr.bf16.mxu0 %v906_v0  ;;  %739 = vmatprep.subr.bf16.mxu1 %v906_v0  ;;  %v818_v13 = vld [vmem:[#allocation4] sm:$0xff]   ;;  %v819_v14 = vld [vmem:[#allocation4 + $0x8] sm:$0xff]   ;;  %v820_v15 = vld [vmem:[#allocation4 + $0x10] sm:$0xff]   ;;  %s303_s26 = scalar_lea.vmem %s1090_s7, %s687_s28 }
  0x48   : > { %v305_v2 = vld [vmem:[%s299_s13] sm:$0xff]  ;;  %v821_v16 = vld [vmem:[#allocation4 + $0x18] sm:$0xff]   ;;  %v823_v18 = vld [vmem:[#allocation4 + $0x28] sm:$0xff]  }
  0x49   : > { %v306_v4 = vpack.c.bf16 %v305_v2, %v305_v2  ;;  %v822_v17 = vld [vmem:[#allocation4 + $0x20] sm:$0xff]   ;;  %v824_v27 = vld [vmem:[#allocation4 + $0x30] sm:$0xff]   ;;  %v825_v28 = vld [vmem:[#allocation4 + $0x38] sm:$0xff]  }
  0x4a   : > { %740 = vmatpush3.bf16.msra.mxu1 %v811_v6  ;;  %v689_v19 = vld [vmem:[%s1085_s2] ss:$0 sm:$0xff] }
  0x4b   : > { %734 = vmatmul.mubr.msk.bf16.vlgmr.msra.gmra.mrb[0].mxu0 %vm315_vm2, %v306_v4  ;;  %741 = vmatprep.subr.bf16.mxu1 %v906_v0  ;;  %v691_v29 = vld [vmem:[%s1087_s4] ss:$0 sm:$0xff] }
  0x4c   : > { %773 = vmatprep.mubr.msk.bf16.mxu0 %vm907_vm0, %v906_v0  ;;  %758 = vmatpush3.bf16.msra.mxu0 %v818_v13  ;;  %v700_v37 = vld [vmem:[%s1089_s6] ss:$0 sm:$0xff] }
  0x4d   : > { %759 = vmatprep.subr.bf16.mxu0 %v906_v0 }
  0x4e   : > { %742 = vmatpush3.bf16.msra.mxu1 %v812_v7 }
  0x4f   : > { %743 = vmatprep.subr.bf16.mxu1 %v906_v0 }
  0x50   : > { %760 = vmatpush3.bf16.msra.mxu0 %v819_v14 }
  0x51   : > { %761 = vmatprep.subr.bf16.mxu0 %v906_v0 }
  0x52   : > { %744 = vmatpush3.bf16.msra.mxu1 %v813_v8 }
  0x53   : > { %745 = vmatprep.subr.bf16.mxu1 %v906_v0 }
  0x54   : > { %762 = vmatpush3.bf16.msra.mxu0 %v820_v15 }
  0x55   : > { %763 = vmatprep.subr.bf16.mxu0 %v906_v0 }
  0x56   : > { %746 = vmatpush3.bf16.msra.mxu1 %v814_v9 }
  0x57   : > { %747 = vmatprep.subr.bf16.mxu1 %v906_v0 }
  0x58   : > { %764 = vmatpush3.bf16.msra.mxu0 %v821_v16 }
  0x59   : > { %765 = vmatprep.subr.bf16.mxu0 %v906_v0 }
  0x5a   : > { %748 = vmatpush3.bf16.msra.mxu1 %v815_v10 }
  0x5b   : > { %749 = vmatprep.subr.bf16.mxu1 %v906_v0 }
  0x5c   : > { %766 = vmatpush3.bf16.msra.mxu0 %v822_v17 }
  0x5d   : > { %767 = vmatprep.subr.bf16.mxu0 %v906_v0 }
  0x5e   : > { %750 = vmatpush3.bf16.msra.mxu1 %v816_v11 }
  0x5f   : > { %751 = vmatprep.subr.bf16.mxu1 %v906_v0 }
  0x60   : > { %768 = vmatpush3.bf16.msra.mxu0 %v823_v18 }
  0x61   : > { %769 = vmatprep.subr.bf16.mxu0 %v906_v0 }
  0x62   : > { %752 = vmatpush3.bf16.msra.mxu1 %v817_v12 }
  0x64   : > { %770 = vmatpush3.bf16.msra.mxu0 %v824_v27 }
  0x65   : > { %771 = vmatprep.subr.bf16.mxu0 %v906_v0 }
  0x68   : > { %772 = vmatpush3.bf16.msra.mxu0 %v825_v28 }
 0x11e   : > { %v357_v20 = vpop.f32.mrb[0].mxu0 }
 0x11f   : > { %v358_v21 = vadd.f32 %v689_v19, %v357_v20  ;;  %v735_v22 = vpop.f32.mrb[1].mxu0 }
 0x120   : > { %v360_v23 = vpop.f32.mrb[2].mxu0 }
 0x121   : > { %v363_v24 = vmax.f32 %v358_v21, 0.0  ;;  %v736_v25 = vpop.f32.mrb[3].mxu0 }
 0x123   : > { %v364_v26 = vpack.c.bf16 %v363_v24, %v363_v24 }
 0x125   : > { %754 = vmatmul.mubr.bf16.vlgmr.msra.gmra.mrb[0].mxu1 %v364_v26 }
 0x1f8   : > { %v470_v30 = vpop.f32.mrb[0].mxu1 }
 0x1f9   : > { %v471_v31 = vadd.f32 %v691_v29, %v470_v30  ;;  %v755_v32 = vpop.f32.mrb[1].mxu1 }
 0x1fa   : > { %v473_v33 = vpop.f32.mrb[2].mxu1 }
 0x1fb   : > { %v476_v34 = vmax.f32 %v471_v31, 0.0  ;;  %v756_v35 = vpop.f32.mrb[3].mxu1 }
 0x1fd   : > { %v477_v36 = vpack.c.bf16 %v476_v34, %v476_v34 }
 0x1ff   : > { %774 = vmatmul.mubr.bf16.vlgmr.msra.gmra.mrb[4].mxu0 %v477_v36 }
 0x2d2   : > { %v583_v38 = vpop.f32.mrb[4].mxu0 }
 0x2d3   : > { %v584_v39 = vadd.f32 %v700_v37, %v583_v38  ;;  %v775_v40 = vpop.f32.mrb[5].mxu0 }
 0x2d4   : > { %v586_v41 = vpop.f32.mrb[6].mxu0 }
 0x2d5   : > { %589 = vmax.xlane.f32.xlu0 %v584_v39  ;;  %v776_v42 = vpop.f32.mrb[7].mxu0 }
 0x362   : > { %v590_v43 = vpop.xlane.xlu0 %589 }
 0x363   : > { %v591_v44 = vsub.f32 %v584_v39, %v590_v43 }
 0x365   : > { %v592_v45 = vmul.f32 1.442695, %v591_v44 }
 0x367   : > { %826 = vpow2.f32 %v592_v45 }
 0x371   : > { %v827_v46 = vpop.eup %826 }
 0x372   : > { %594 = vadd.xlane.f32.xlu0 %v827_v46 }
 0x3ff   : > { %v595_v47 = vpop.xlane.xlu0 %594 }
 0x400   : > { %828 = vrcp.f32 %v595_v47 }
 0x40a   : > { %v829_v48 = vpop.eup %828 }
 0x40b   : > { %v597_v49 = vmul.f32 %v829_v48, %v595_v47 }
 0x40d   : > { %v598_v50 = vsub.f32 2.0, %v597_v49 }
 0x40f   : > { %v599_v51 = vmul.f32 %v829_v48, %v598_v50 }
 0x411   : > { %v600_v52 = vmul.f32 %v827_v46, %v599_v51 }
 0x413   : > { %602 = vst.msk [vmem:[%s303_s26] sm:$0xff] %vm601_vm3, %v600_v52 }
 0x414 PF: > { %s19_s24 = sadd.s32 1, %s900_s24  }
 0x415   : > { %p16_p5 = scmp.ge.s32.totalorder %s19_s24, 4  }
 0x417   :  { %18 = sbr.rel (!%p16_p5) target bundleno = 2 (0x2), region = 87 }
 0x41e   :  { %622 = vsyncpa [#allocation3], 1 }
 0x41f   :  { %624 = vsyncpa [#allocation3 + $0x1], 1 }
 0x420   :  { %625 = vsyncpa [#allocation5], 1 }

</bundles_post_ra>
